<compile_context>
chip_gen: v5e
topology: v5e:2x2
jax: 0.10.0
libtpu: 0.0.40
codegen_flags: <defaults>
</compile_context>

<pallas_src>
import functools

import jax
import jax.numpy as jnp
from jax.experimental import pallas as pl
from jax.experimental.pallas import tpu as pltpu


def _classifier_kernel(x_ref, we_ref, be_ref, wh_ref, bh_ref, o_ref, *, bt, P):
    """Fused backbone + head for one batch block (grid axis = batch blocks).

    x_ref : (Bt*P, Dp)  bf16  flattened patches of Bt images
    we_ref: (Dp, Hd)    bf16  patch-embedding weight
    be_ref: (1, Hd)     f32   patch-embedding bias
    wh_ref: (Hd, NLp)   bf16  classifier head weight (pre-scaled by 1/P, zero-padded)
    bh_ref: (1, NLp)    f32   classifier head bias   (zero-padded)
    o_ref : (Bt, NLp)   f32   lane-dense logits tile for this block
    """
    # Patch embedding: one big MXU matmul for the whole block (bf16 in, f32 acc).
    feats = jnp.dot(x_ref[...], we_ref[...],
                    preferred_element_type=jnp.float32)          # (Bt*P, Hd) f32
    feats = jax.nn.gelu(feats + be_ref[...])                     # f32 VPU/EUP

    # Global sum-pool over patches per image (mean folded into head weight).
    pooled = feats.reshape(bt, P, feats.shape[-1]).sum(axis=1)   # (Bt, Hd) f32

    # Batched classifier head: single (Bt, Hd) x (Hd, NLp) matmul, bias added once.
    logits = jnp.dot(pooled.astype(wh_ref.dtype), wh_ref[...],
                     preferred_element_type=jnp.float32)         # (Bt, NLp) f32
    o_ref[...] = logits + bh_ref[...]


@functools.partial(jax.jit, static_argnames=("patch",))
def pretrained_image_classifier_forward(x_nchw, w_embed, b_embed, w_head, b_head,
                                        patch=4):
    """Plain-JAX glue (patch extraction, padding) + fused Pallas kernel."""
    B, C, H, W = x_nchw.shape
    p = patch
    Hp, Wp = H // p, W // p
    P = Hp * Wp
    Dp = C * p * p
    Hd = w_embed.shape[1]
    NL = w_head.shape[1]
    NLp = ((NL + 127) // 128) * 128          # lane-dense (multiple of 128) head width

    # bf16 BEFORE the transpose/reshape -> half the materialized patches HBM traffic.
    xb = x_nchw.astype(jnp.bfloat16)
    # NCHW -> [B, P, Dp] (channel-major inside each patch, like a Conv2d patch-embed).
    patches = xb.reshape(B, C, Hp, p, Wp, p).transpose(0, 2, 4, 1, 3, 5)
    patches = patches.reshape(B, P, Dp)

    # Pick Bt so each embed matmul has ~128-256 rows; keep a batch grid axis when
    # B is large (megacore on v7x), collapse to a single step for tiny B.
    target_rows = 256
    bt = max(1, target_rows // P)
    if bt >= B:
        bt, n_blocks = B, 1                  # single block == full array (layout OK)
    else:
        bt = max(8, (bt // 8) * 8)           # keep row-block a multiple of 8
        n_blocks = pl.cdiv(B, bt)
    B_pad = bt * n_blocks
    if B_pad != B:
        patches = jnp.pad(patches, ((0, B_pad - B), (0, 0), (0, 0)))
    patches2d = patches.reshape(B_pad * P, Dp)                   # rows pre-flattened

    # Weights: bf16 MXU operands; head pre-scaled by 1/P (sum-pool == mean-pool),
    # padded to the lane-dense output width.
    we = w_embed.astype(jnp.bfloat16)
    be = b_embed.reshape(1, Hd).astype(jnp.float32)
    wh = jnp.zeros((Hd, NLp), jnp.float32).at[:, :NL].set(
        w_head.astype(jnp.float32) * (1.0 / P)).astype(jnp.bfloat16)
    bh = jnp.zeros((1, NLp), jnp.float32).at[:, :NL].set(
        b_head.reshape(1, NL).astype(jnp.float32))

    kernel = functools.partial(_classifier_kernel, bt=bt, P=P)

    grid_spec = pltpu.PrefetchScalarGridSpec(
        num_scalar_prefetch=0,
        grid=(n_blocks,),
        in_specs=[
            pl.BlockSpec((bt * P, Dp), lambda b: (b, 0)),  # per-block patch rows
            pl.BlockSpec((Dp, Hd), lambda b: (0, 0)),      # embed weight (resident)
            pl.BlockSpec((1, Hd), lambda b: (0, 0)),       # embed bias   (resident)
            pl.BlockSpec((Hd, NLp), lambda b: (0, 0)),     # head weight  (resident)
            pl.BlockSpec((1, NLp), lambda b: (0, 0)),      # head bias    (resident)
        ],
        out_specs=pl.BlockSpec((bt, NLp), lambda b: (b, 0)),  # lane-dense logits tile
    )

    out = pl.pallas_call(
        kernel,
        out_shape=jax.ShapeDtypeStruct((B_pad, NLp), jnp.float32),
        grid_spec=grid_spec,
        compiler_params=pltpu.CompilerParams(
            dimension_semantics=("parallel",),     # shard batch blocks across TCs
            vmem_limit_bytes=32 * 1024 * 1024),    # safe under v7x 64 MiB physical
    )(patches2d, we, be, wh, bh)

    return out[:B, :NL]


def _reference_forward(x_nchw, w_embed, b_embed, w_head, b_head, patch=4):
    """Pure f32 JAX reference of the same synthetic backbone + head."""
    B, C, H, W = x_nchw.shape
    p = patch
    Hp, Wp = H // p, W // p
    patches = x_nchw.reshape(B, C, Hp, p, Wp, p).transpose(0, 2, 4, 1, 3, 5)
    patches = patches.reshape(B, Hp * Wp, C * p * p).astype(jnp.float32)
    feats = jax.nn.gelu(patches @ w_embed + b_embed[None])
    pooled = feats.mean(axis=1)
    return pooled @ w_head + b_head


if __name__ == "__main__":
    # Small shapes consistent with an image-classifier forward.
    B, C, H, W = 2, 4, 16, 16
    patch = 4
    hidden = 128          # synthetic backbone width
    num_labels = 8        # config.num_labels

    key = jax.random.PRNGKey(0)
    kx, kwe, kbe, kwh, kbh = jax.random.split(key, 5)

    x = jax.random.normal(kx, (B, C, H, W), dtype=jnp.float32)

    Dp = C * patch * patch
    # Deterministic synthetic parameters (stand-in for "pretrained" weights).
    w_embed = jax.random.normal(kwe, (Dp, hidden), dtype=jnp.float32) * 0.05
    b_embed = jax.random.normal(kbe, (1, hidden), dtype=jnp.float32) * 0.01
    w_head = jax.random.normal(kwh, (hidden, num_labels), dtype=jnp.float32) * 0.05
    b_head = jax.random.normal(kbh, (1, num_labels), dtype=jnp.float32) * 0.01

    logits = pretrained_image_classifier_forward(
        x, w_embed, b_embed, w_head, b_head, patch=patch)
    logits = jax.block_until_ready(logits)

    ref = _reference_forward(x, w_embed, b_embed, w_head, b_head, patch=patch)
    assert logits.shape == (B, num_labels)
    # bf16 MXU operands with f32 accumulation -> ~1e-2 relative vs the f32 reference.
    assert jnp.allclose(logits, ref, atol=2e-2, rtol=2e-2), "mismatch vs reference"

    # TODO(synk): the actual HF pretrained backbone / processor weights have no
    # in-script equivalent; this kernel implements a representative synthetic
    # patch-embed backbone + linear classifier head.
    print("KERNEL_OK")
</pallas_src>

<mosaic_0001>
module attributes {stable_mosaic.version = 11 : i64} {
  func.func @_classifier_kernel(%arg0: i32, %arg1: memref<32x64xbf16, #tpu.memory_space<vmem>>, %arg2: memref<64x128xbf16, #tpu.memory_space<vmem>>, %arg3: memref<1x128xf32, #tpu.memory_space<vmem>>, %arg4: memref<128x128xbf16, #tpu.memory_space<vmem>>, %arg5: memref<1x128xf32, #tpu.memory_space<vmem>>, %arg6: memref<2x128xf32, #tpu.memory_space<vmem>>) attributes {dimension_semantics = [#tpu.dimension_semantics<parallel>], iteration_bounds = array<i64: 1>, scalar_prefetch = 0 : i64, scratch_operands = 0 : i64, tpu.core_type = #tpu.core_type<tc>, window_params = [{transform_indices = @transform_0, window_bounds = array<i64: 32, 64>}, {pipeline_mode = #tpu.pipeline_mode<synchronous>, transform_indices = @transform_1, window_bounds = array<i64: 64, 128>}, {pipeline_mode = #tpu.pipeline_mode<synchronous>, transform_indices = @transform_2, window_bounds = array<i64: 1, 128>}, {pipeline_mode = #tpu.pipeline_mode<synchronous>, transform_indices = @transform_3, window_bounds = array<i64: 128, 128>}, {pipeline_mode = #tpu.pipeline_mode<synchronous>, transform_indices = @transform_4, window_bounds = array<i64: 1, 128>}, {transform_indices = @transform_5, window_bounds = array<i64: 2, 128>}]} {
    %c0 = arith.constant 0 : index
    %c0_0 = arith.constant 0 : index
    %0 = vector.load %arg1[%c0, %c0_0] : memref<32x64xbf16, #tpu.memory_space<vmem>>, vector<32x64xbf16>
    %c0_1 = arith.constant 0 : index
    %c0_2 = arith.constant 0 : index
    %1 = vector.load %arg2[%c0_1, %c0_2] : memref<64x128xbf16, #tpu.memory_space<vmem>>, vector<64x128xbf16>
    %cst = arith.constant dense<0.000000e+00> : vector<32x128xf32>
    %2 = tpu.matmul %0, %1, %cst {dimension_numbers = #tpu.dot_dimension_numbers<[1], [0], [0], [1], [0, 0, 1, 1], [], []>} : vector<32x64xbf16>, vector<64x128xbf16>, vector<32x128xf32> -> vector<32x128xf32>
    %c0_3 = arith.constant 0 : index
    %c0_4 = arith.constant 0 : index
    %3 = vector.load %arg3[%c0_3, %c0_4] : memref<1x128xf32, #tpu.memory_space<vmem>>, vector<1x128xf32>
    %4 = vector.broadcast %3 : vector<1x128xf32> to vector<32x128xf32>
    %5 = arith.addf %2, %4 : vector<32x128xf32>
    %6 = arith.mulf %5, %5 : vector<32x128xf32>
    %7 = arith.mulf %5, %6 : vector<32x128xf32>
    %cst_5 = arith.constant 4.471500e-02 : f32
    %8 = vector.broadcast %cst_5 : f32 to vector<32x128xf32>
    %9 = arith.mulf %8, %7 : vector<32x128xf32>
    %10 = arith.addf %5, %9 : vector<32x128xf32>
    %cst_6 = arith.constant 0.797884583 : f32
    %11 = vector.broadcast %cst_6 : f32 to vector<32x128xf32>
    %12 = arith.mulf %11, %10 : vector<32x128xf32>
    %13 = math.tanh %12 : vector<32x128xf32>
    %cst_7 = arith.constant 1.000000e+00 : f32
    %14 = vector.broadcast %cst_7 : f32 to vector<32x128xf32>
    %15 = arith.addf %14, %13 : vector<32x128xf32>
    %cst_8 = arith.constant 5.000000e-01 : f32
    %16 = vector.broadcast %cst_8 : f32 to vector<32x128xf32>
    %17 = arith.mulf %16, %15 : vector<32x128xf32>
    %18 = arith.mulf %5, %17 : vector<32x128xf32>
    %19 = vector.shape_cast %18 : vector<32x128xf32> to vector<2x16x128xf32>
    %cst_9 = arith.constant dense<0.000000e+00> : vector<2x128xf32>
    %20 = vector.multi_reduction <add>, %19, %cst_9 [1] : vector<2x16x128xf32> to vector<2x128xf32>
    %21 = arith.truncf %20 : vector<2x128xf32> to vector<2x128xbf16>
    %c0_10 = arith.constant 0 : index
    %c0_11 = arith.constant 0 : index
    %22 = vector.load %arg4[%c0_10, %c0_11] : memref<128x128xbf16, #tpu.memory_space<vmem>>, vector<128x128xbf16>
    %cst_12 = arith.constant dense<0.000000e+00> : vector<2x128xf32>
    %23 = tpu.matmul %21, %22, %cst_12 {dimension_numbers = #tpu.dot_dimension_numbers<[1], [0], [0], [1], [0, 0, 1, 1], [], []>} : vector<2x128xbf16>, vector<128x128xbf16>, vector<2x128xf32> -> vector<2x128xf32>
    %c0_13 = arith.constant 0 : index
    %c0_14 = arith.constant 0 : index
    %24 = vector.load %arg5[%c0_13, %c0_14] : memref<1x128xf32, #tpu.memory_space<vmem>>, vector<1x128xf32>
    %25 = vector.broadcast %24 : vector<1x128xf32> to vector<2x128xf32>
    %26 = arith.addf %23, %25 : vector<2x128xf32>
    %c0_15 = arith.constant 0 : index
    %c0_16 = arith.constant 0 : index
    %27 = vector.load %arg6[%c0_15, %c0_16] : memref<2x128xf32, #tpu.memory_space<vmem>>, vector<2x128xf32>
    tpu.vector_store %arg6[%c0_15, %c0_16], %26 {strides = array<i32>} : memref<2x128xf32, #tpu.memory_space<vmem>>, vector<2x128xf32>,
    return
  }
  func.func @transform_0(%arg0: i32) -> (i32, i32) {
    %c0_i32 = arith.constant 0 : i32
    %c0_i32_0 = arith.constant 0 : i32
    return %arg0, %c0_i32 : i32, i32
  }
  func.func @transform_1(%arg0: i32) -> (i32, i32) {
    %c0_i32 = arith.constant 0 : i32
    %c0_i32_0 = arith.constant 0 : i32
    %c0_i32_1 = arith.constant 0 : i32
    return %c0_i32, %c0_i32_0 : i32, i32
  }
  func.func @transform_2(%arg0: i32) -> (i32, i32) {
    %c0_i32 = arith.constant 0 : i32
    %c0_i32_0 = arith.constant 0 : i32
    %c0_i32_1 = arith.constant 0 : i32
    return %c0_i32, %c0_i32_0 : i32, i32
  }
  func.func @transform_3(%arg0: i32) -> (i32, i32) {
    %c0_i32 = arith.constant 0 : i32
    %c0_i32_0 = arith.constant 0 : i32
    %c0_i32_1 = arith.constant 0 : i32
    return %c0_i32, %c0_i32_0 : i32, i32
  }
  func.func @transform_4(%arg0: i32) -> (i32, i32) {
    %c0_i32 = arith.constant 0 : i32
    %c0_i32_0 = arith.constant 0 : i32
    %c0_i32_1 = arith.constant 0 : i32
    return %c0_i32, %c0_i32_0 : i32, i32
  }
  func.func @transform_5(%arg0: i32) -> (i32, i32) {
    %c0_i32 = arith.constant 0 : i32
    %c0_i32_0 = arith.constant 0 : i32
    return %arg0, %c0_i32 : i32, i32
  }
}

</mosaic_0001>

<bundles_post_ra>
// kernel: pretrained_image_classifier_forward.1
= control target key start
LH: loop header
LB: loop body
LE: loop exit
PB: predicated region body
PF: predicated region fallthrough
CT: control target
= control target key end

     0   :  { %s451_s0 = inlined_call_operand.vmem [shape: bf16[32,64], index: 0, kind: input, shape index: {}]   ;;  %s452_s1 = inlined_call_operand.vmem [shape: bf16[64,128], index: 1, kind: input, shape index: {}]   ;;  %s453_s2 = inlined_call_operand.vmem [shape: f32[1,128], index: 2, kind: input, shape index: {}]   ;;  %s454_s3 = inlined_call_operand.vmem [shape: bf16[128,128], index: 3, kind: input, shape index: {}]   ;;  %s455_s4 = inlined_call_operand.vmem [shape: f32[1,128], index: 4, kind: input, shape index: {}]   ;;  %s456_s5 = inlined_call_operand.hbm [shape: f32[2,128], index: 5, kind: output, shape index: {}]  }
   0x1   :  { %v319_v0 = vld [vmem:[%s452_s1 + $0x18] sm:$0xff]  ;;  %v318_v1 = vld [vmem:[%s452_s1 + $0x10] sm:$0xff] }
   0x2   :  { %83 = vmatpush.bf16.msra.mxu0 %v319_v0  ;;  %328 = vmatpush.bf16.msra.mxu2 %v319_v0 }
   0x3   :  { %10 = vsyncpa [#allocation3], 0  ;;  %v317_v2 = vld [vmem:[%s452_s1 + $0x8] sm:$0xff]  ;;  %v316_v3 = vld [vmem:[%s452_s1] sm:$0xff]  ;;  %vm72_vm0 = vcmask 523264   ;;  %vm174_vm1 = vcmask 1041409  }
   0x4   :  { %v314_v4 = vld [vmem:[%s451_s0] sm:$0xff]  ;;  %v315_v5 = vld [vmem:[%s451_s0 + $0x8] sm:$0xff]  ;;  %v327_v6 = vld [vmem:[%s454_s3 + $0x38] sm:$0xff]  ;;  %s369_s21 = smov [#allocation2]   ;;  %s247_s25 = sshll.u32 %s456_s5, 4  ;;  %s248_s25 = int_to_ptr.hbm [resolvable:$true] %s247_s25 }
   0x5   :  { %v333_v7 = vld [vmem:[%s453_s2] ss:$0 sm:$0xff]  ;;  %226 = vmatpush.bf16.msra.mxu1 %v327_v6  ;;  %v326_v9 = vld [vmem:[%s454_s3 + $0x30] sm:$0xff]  ;;  %v325_v12 = vld [vmem:[%s454_s3 + $0x28] sm:$0xff]  ;;  %s245_s22 = sshll.u32 %s369_s21, 4  ;;  %s246_s22 = int_to_ptr.vmem [resolvable:$true] %s245_s22 }
   0x6   :  { %84 = vmatpush.bf16.msra.mxu0 %v318_v1  ;;  %329 = vmatpush.bf16.msra.mxu2 %v318_v1  ;;  %v324_v18 = vld [vmem:[%s454_s3 + $0x20] sm:$0xff]  ;;  %v323_v22 = vld [vmem:[%s454_s3 + $0x18] sm:$0xff]  ;;  %v322_v29 = vld [vmem:[%s454_s3 + $0x10] sm:$0xff] }
   0x7   :  { %v321_v36 = vld [vmem:[%s454_s3 + $0x8] sm:$0xff]  ;;  %v320_v41 = vld [vmem:[%s454_s3] sm:$0xff] }
   0x9   :  { %227 = vmatpush.bf16.msra.mxu1 %v326_v9 }
   0xa   :  { %85 = vmatpush.bf16.msra.mxu0 %v317_v2  ;;  %330 = vmatpush.bf16.msra.mxu2 %v317_v2 }
   0xd   :  { %228 = vmatpush.bf16.msra.mxu1 %v325_v12 }
   0xe   :  { %86 = vmatpush.bf16.msra.mxu0 %v316_v3  ;;  %331 = vmatpush.bf16.msra.mxu2 %v316_v3 }
  0x11   :  { %280 = vmatmul.msk.bf16.vlgmr.msra.gmra.mxu0 %vm72_vm0, %v314_v4  ;;  %281 = vmatmul.msk.bf16.vlgmr.msra.gmra.mxu2 %vm72_vm0, %v315_v5 }
  0x12   :  { %229 = vmatpush.bf16.msra.mxu1 %v324_v18 }
  0x16   :  { %230 = vmatpush.bf16.msra.mxu1 %v323_v22 }
  0x1a   :  { %231 = vmatpush.bf16.msra.mxu1 %v322_v29 }
  0x1e   :  { %232 = vmatpush.bf16.msra.mxu1 %v321_v36 }
  0x22   :  { %233 = vmatpush.bf16.msra.mxu1 %v320_v41 }
  0x8e   :  { %v88_v8 = vpop.f32.mrf.mxu0 }
  0x8f   :  { %v89_v10 = vadd.f32 %v333_v7, %v88_v8 }
  0x91   :  { %v98_v11 = vmul.f32 %v89_v10, %v89_v10 }
  0x93   :  { %v102_v13 = vmul.f32 %v98_v11, %v89_v10 }
  0x94   :  { %v93_v14 = vpop.f32.mrf.mxu2 }
  0x95   :  { %v106_v15 = vmul.f32 0.044715, %v102_v13  ;;  %v94_v16 = vadd.f32 %v333_v7, %v93_v14 }
  0x96   :  { %v90_v17 = vpop.f32.mrf.mxu0 }
  0x97   :  { %v110_v19 = vadd.f32 %v106_v15, %v89_v10  ;;  %v100_v20 = vmul.f32 %v94_v16, %v94_v16  ;;  %v91_v21 = vadd.f32 %v333_v7, %v90_v17  ;;  %v334_v15 = vld [vmem:[%s455_s4] ss:$0 sm:$0xff] }
  0x99   :  { %v114_v23 = vmul.f32 0.7978846, %v110_v19  ;;  %v104_v24 = vmul.f32 %v100_v20, %v94_v16  ;;  %v99_v25 = vmul.f32 %v91_v21, %v91_v21 }
  0x9b   :  { %v108_v26 = vmul.f32 0.044715, %v104_v24  ;;  %v103_v27 = vmul.f32 %v99_v25, %v91_v21  ;;  %335 = vtanh.f32 %v114_v23 }
  0x9c   :  { %v95_v28 = vpop.f32.mrf.mxu2 }
  0x9d   :  { %v112_v30 = vadd.f32 %v108_v26, %v94_v16  ;;  %v107_v31 = vmul.f32 0.044715, %v103_v27  ;;  %v96_v32 = vadd.f32 %v333_v7, %v95_v28 }
  0x9f   :  { %v116_v33 = vmul.f32 0.7978846, %v112_v30  ;;  %v111_v34 = vadd.f32 %v107_v31, %v91_v21  ;;  %v101_v35 = vmul.f32 %v96_v32, %v96_v32 }
  0xa1   :  { %v115_v37 = vmul.f32 0.7978846, %v111_v34  ;;  %v105_v38 = vmul.f32 %v101_v35, %v96_v32  ;;  %337 = vtanh.f32 %v116_v33  ;;  %v336_v39 = vpop.eup %335 }
  0xa2   :  { %v122_v43 = vadd.f32 1.0, %v336_v39 }
  0xa3   :  { %339 = vtanh.f32 %v115_v37  ;;  %v109_v40 = vmul.f32 0.044715, %v105_v38 }
  0xa4   :  { %v126_v47 = vmul.f32 0.5, %v122_v43 }
  0xa5   :  { %v113_v42 = vadd.f32 %v109_v40, %v96_v32 }
  0xa6   :  { %v130_v51 = vmul.f32 %v126_v47, %v89_v10 }
  0xa7   :  { %v117_v44 = vmul.f32 0.7978846, %v113_v42  ;;  %v338_v45 = vpop.eup %337 }
  0xa8   :  { %v124_v49 = vadd.f32 1.0, %v338_v45 }
  0xa9   :  { %v340_v46 = vpop.eup %339  ;;  %341 = vtanh.f32 %v117_v44 }
  0xaa   :  { %v123_v48 = vadd.f32 1.0, %v340_v46  ;;  %v128_v54 = vmul.f32 0.5, %v124_v49 }
  0xac   :  { %v127_v50 = vmul.f32 0.5, %v123_v48  ;;  %v132_v59 = vmul.f32 %v128_v54, %v94_v16 }
  0xae   :  { %v131_v52 = vmul.f32 %v127_v50, %v91_v21 }
  0xaf   :  { %v342_v53 = vpop.eup %341 }
  0xb0   :  { %v134_v55 = vadd.f32 %v131_v52, %v130_v51  ;;  %v125_v56 = vadd.f32 1.0, %v342_v53 }
  0xb2   :  { %v135_v57 = vrot.slane %v134_v55, 4  ;;  %v129_v58 = vmul.f32 0.5, %v125_v56 }
  0xb4   :  { %v133_v60 = vmul.f32 %v129_v58, %v96_v32  ;;  %v136_v61 = vadd.f32 %v135_v57, %v134_v55 }
  0xb6   :  { %v141_v62 = vadd.f32 %v133_v60, %v132_v59  ;;  %v137_v63 = vrot.slane %v136_v61, 2 }
  0xb8   :  { %v142_v0 = vrot.slane %v141_v62, 4  ;;  %v138_v1 = vadd.f32 %v137_v63, %v136_v61 }
  0xba   :  { %v139_v2 = vrot.slane %v138_v1, 1  ;;  %v143_v3 = vadd.f32 %v142_v0, %v141_v62 }
  0xbc   :  { %v144_v4 = vrot.slane %v143_v3, 2  ;;  %v140_v5 = vadd.f32 %v139_v2, %v138_v1 }
  0xbe   :  { %v145_v6 = vadd.f32 %v144_v4, %v143_v3  ;;  %v148_v9 = vpack.c.bf16 %v140_v5, %v140_v5 }
  0xc0   :  { %v146_v7 = vrot.slane %v145_v6, 1  ;;  %v172_v11 = vunpack.c.l.b16 %v148_v9 }
  0xc2   :  { %v147_v8 = vadd.f32 %v146_v7, %v145_v6 }
  0xc4   :  { %v149_v10 = vpack.c.bf16 %v147_v8, %v147_v8 }
  0xc6   :  { %v173_v12 = vunpack.c.l.b16 %v149_v10 }
  0xc8   :  { %v175_v13 = vsel %vm174_vm1, %v173_v12, %v172_v11 }
  0xc9   :  { %v176_v14 = vpack.c.b16 %v175_v13, %v175_v13 }
  0xcb   :  { %234 = vmatmul.bf16.vlgmr.msra.gmra.mxu1 %v176_v14 }
 0x148   :  { %v235_v16 = vpop.f32.mrf.mxu1 }
 0x149   :  { %v236_v17 = vadd.f32 %v334_v15, %v235_v16 }
 0x14b   :  { %239 = vst [vmem:[#allocation2] sm:$0x3] %v236_v17 }
 0x14c   :  { %250 = dma.vmem_to_hbm [thread:$0]  %s246_s22, 32, %s248_s25, [#allocation3]  }
 0x150   :  { %v237_v18 = vpop.f32.mrf.mxu1 }
 0x151   :  { %367 = dma.done.wait [#allocation3], 32  }
 0x152   :  { %368 = vsyncadd [#allocation3], 4294967264 }
 0x153   :  { %255 = vsyncpa [#allocation3], 1 }

</bundles_post_ra>
